<compile_context>
chip_gen: v7x
topology: tpu7x:2x2x1
jax: 0.10.0
libtpu: 0.0.40
codegen_flags: <defaults>
</compile_context>

<pallas_src>
import jax
import jax.numpy as jnp
from jax.experimental import pallas as pl
from jax.experimental.pallas import tpu as pltpu

LATENT_DIM = 128
HIDDEN = 256
NEG_SLOPE = 0.2
MAX_TILE = 2048        # rows per grid step (cap): ~0.5 MiB bf16 input block,
                       # ~2 MiB f32 hidden — comfortably inside VMEM on v5e/v6e/v7x
SPLIT_THRESHOLD = 512  # below this, a single grid step (overhead-dominated anyway)


# ----------------------------- Pallas kernel -------------------------------

def _disc_z_kernel(z_ref, w1_ref, b1_ref, w2_ref, b2_ref, o_ref):
    """Whole DiscriminatorZ forward for one batch tile, fully in VMEM.

    z_ref : (tile, 128) bf16   latent vectors
    w1_ref: (128, 256)  bf16   Linear(128,256) weight, transposed to (in, out)
    b1_ref: (1, 256)    f32
    w2_ref: (1, 256)    f32    Linear(256,1) weight as a row (PyTorch layout)
    b2_ref: (1, 1)      f32    SMEM scalar
    o_ref : (tile, 1)   f32
    """
    # Layer 1 on the MXU: bf16 operands, f32 accumulation.
    h = jnp.dot(z_ref[...], w1_ref[...], preferred_element_type=jnp.float32)
    h = h + b1_ref[...]
    # LeakyReLU(0.2): single mul + max on the VPU.
    h = jnp.maximum(h, NEG_SLOPE * h)
    # Layer 2 (256 -> 1): broadcast-multiply + lane reduce (XLU) instead of a
    # 1-column MXU matmul.
    logit = jnp.sum(h * w2_ref[...], axis=-1, keepdims=True) + b2_ref[0, 0]
    o_ref[...] = jax.nn.sigmoid(logit)


# ------------------------------- wrapper ------------------------------------

def _round_up(x, m):
    return -(-x // m) * m


def _choose_tile(n):
    """Rows per grid step.

    - tiny batches: one block (tile == n keeps the 'full dim' layout rule valid
      even when n is not a multiple of 8)
    - large batches: >= 2 grid steps (so the 'parallel' axis can shard across
      v7x's two TensorCores), rounded to a multiple of 256 (keeps the 256-wide
      MXU on v6e/v7x fed), capped at MAX_TILE (safe under v5e's 16 MiB default
      scoped VMEM).
    """
    if n <= SPLIT_THRESHOLD:
        return n
    half = _round_up(-(-n // 2), 256)
    return max(256, min(MAX_TILE, half))


def discriminator_z(z, params):
    """z: (N, 128). params in PyTorch Linear layout. Returns (N, 1) f32."""
    w1, b1, w2, b2 = params["w1"], params["b1"], params["w2"], params["b2"]
    N, D = z.shape
    assert D == LATENT_DIM

    # bf16 for the MXU layer (halves the dominant HBM stream; in a real
    # pipeline z arrives bf16 / the cast fuses with the producer).
    z_bf = z.astype(jnp.bfloat16)
    w1m = w1.T.astype(jnp.bfloat16)               # (128, 256), (in, out)
    b1m = b1.reshape(1, HIDDEN).astype(jnp.float32)
    w2m = w2.reshape(1, HIDDEN).astype(jnp.float32)
    b2m = b2.reshape(1, 1).astype(jnp.float32)

    tile = _choose_tile(N)
    # No host-side pad: ragged last block; out-of-bounds rows are masked on
    # writeback (per-row math only, so garbage in padded input rows is harmless).
    grid = (pl.cdiv(N, tile),)

    out = pl.pallas_call(
        _disc_z_kernel,
        grid=grid,
        in_specs=[
            pl.BlockSpec((tile, LATENT_DIM), lambda i: (i, 0)),
            # weights/biases: constant block index -> stay resident in VMEM
            pl.BlockSpec((LATENT_DIM, HIDDEN), lambda i: (0, 0)),
            pl.BlockSpec((1, HIDDEN), lambda i: (0, 0)),
            pl.BlockSpec((1, HIDDEN), lambda i: (0, 0)),
            # b2: single scalar, keep it in SMEM
            pl.BlockSpec(memory_space=pltpu.MemorySpace.SMEM),
        ],
        out_specs=pl.BlockSpec((tile, 1), lambda i: (i, 0)),
        out_shape=jax.ShapeDtypeStruct((N, 1), jnp.float32),
        compiler_params=pltpu.CompilerParams(
            # batch tiles are independent -> shard across v7x's 2 TensorCores
            dimension_semantics=("parallel",),
        ),
    )(z_bf, w1m, b1m, w2m, b2m)

    return out


def _reference(z, params):
    """Plain-JAX (f32) reference matching the PyTorch forward."""
    h = z @ params["w1"].T + params["b1"]
    h = jnp.where(h >= 0, h, NEG_SLOPE * h)
    return jax.nn.sigmoid(h @ params["w2"].T + params["b2"])


def init_params(key):
    k1, k2, k3, k4 = jax.random.split(key, 4)
    return dict(
        w1=(0.05 * jax.random.normal(k1, (HIDDEN, LATENT_DIM))).astype(jnp.float32),
        b1=(0.05 * jax.random.normal(k2, (HIDDEN,))).astype(jnp.float32),
        w2=(0.05 * jax.random.normal(k3, (1, HIDDEN))).astype(jnp.float32),
        b2=(0.05 * jax.random.normal(k4, (1,))).astype(jnp.float32),
    )


if __name__ == "__main__":
    key = jax.random.PRNGKey(0)
    kz, kz2, kp = jax.random.split(key, 3)
    params = init_params(kp)
    fwd = jax.jit(discriminator_z)

    # Small batch: single grid step, tile == N.
    z_small = jax.random.normal(kz, (2, LATENT_DIM), dtype=jnp.float32)
    out_small = fwd(z_small, params)
    jax.block_until_ready(out_small)
    assert out_small.shape == (2, 1)
    assert bool(jnp.all((out_small >= 0.0) & (out_small <= 1.0)))
    assert bool(jnp.allclose(out_small, _reference(z_small, params), atol=1e-2))

    # Larger batch: 2 grid steps + ragged last block (no host-side pad copy).
    z_big = jax.random.normal(kz2, (600, LATENT_DIM), dtype=jnp.float32)
    out_big = fwd(z_big, params)
    jax.block_until_ready(out_big)
    assert out_big.shape == (600, 1)
    assert bool(jnp.all((out_big >= 0.0) & (out_big <= 1.0)))
    assert bool(jnp.allclose(out_big, _reference(z_big, params), atol=1e-2))

    print("KERNEL_OK")
</pallas_src>

<mosaic_0001>
module attributes {stable_mosaic.version = 11 : i64} {
  func.func @_disc_z_kernel(%arg0: i32, %arg1: memref<2x128xbf16, #tpu.memory_space<vmem>>, %arg2: memref<128x256xbf16, #tpu.memory_space<vmem>>, %arg3: memref<1x256xf32, #tpu.memory_space<vmem>>, %arg4: memref<1x256xf32, #tpu.memory_space<vmem>>, %arg5: memref<1x1xf32, #tpu.memory_space<smem>>, %arg6: memref<2x1xf32, #tpu.memory_space<vmem>>) attributes {dimension_semantics = [#tpu.dimension_semantics<parallel>], iteration_bounds = array<i64: 1>, scalar_prefetch = 0 : i64, scratch_operands = 0 : i64, tpu.core_type = #tpu.core_type<tc>, window_params = [{transform_indices = @transform_0, window_bounds = array<i64: 2, 128>}, {pipeline_mode = #tpu.pipeline_mode<synchronous>, transform_indices = @transform_1, window_bounds = array<i64: 128, 256>}, {pipeline_mode = #tpu.pipeline_mode<synchronous>, transform_indices = @transform_2, window_bounds = array<i64: 1, 256>}, {pipeline_mode = #tpu.pipeline_mode<synchronous>, transform_indices = @transform_3, window_bounds = array<i64: 1, 256>}, {transform_indices = @transform_4, window_bounds = array<i64: 1, 1>}, {transform_indices = @transform_5, window_bounds = array<i64: 2, 1>}]} {
    %c0 = arith.constant 0 : index
    %c0_0 = arith.constant 0 : index
    %0 = vector.load %arg1[%c0, %c0_0] : memref<2x128xbf16, #tpu.memory_space<vmem>>, vector<2x128xbf16>
    %c0_1 = arith.constant 0 : index
    %c0_2 = arith.constant 0 : index
    %1 = vector.load %arg2[%c0_1, %c0_2] : memref<128x256xbf16, #tpu.memory_space<vmem>>, vector<128x256xbf16>
    %cst = arith.constant dense<0.000000e+00> : vector<2x256xf32>
    %2 = tpu.matmul %0, %1, %cst {dimension_numbers = #tpu.dot_dimension_numbers<[1], [0], [0], [1], [0, 0, 1, 1], [], []>} : vector<2x128xbf16>, vector<128x256xbf16>, vector<2x256xf32> -> vector<2x256xf32>
    %c0_3 = arith.constant 0 : index
    %c0_4 = arith.constant 0 : index
    %3 = vector.load %arg3[%c0_3, %c0_4] : memref<1x256xf32, #tpu.memory_space<vmem>>, vector<1x256xf32>
    %4 = vector.broadcast %3 : vector<1x256xf32> to vector<2x256xf32>
    %5 = arith.addf %2, %4 : vector<2x256xf32>
    %cst_5 = arith.constant 2.000000e-01 : f32
    %6 = vector.broadcast %cst_5 : f32 to vector<2x256xf32>
    %7 = arith.mulf %6, %5 : vector<2x256xf32>
    %8 = arith.maximumf %5, %7 : vector<2x256xf32>
    %c0_6 = arith.constant 0 : index
    %c0_7 = arith.constant 0 : index
    %9 = vector.load %arg4[%c0_6, %c0_7] : memref<1x256xf32, #tpu.memory_space<vmem>>, vector<1x256xf32>
    %10 = vector.broadcast %9 : vector<1x256xf32> to vector<2x256xf32>
    %11 = arith.mulf %8, %10 : vector<2x256xf32>
    %cst_8 = arith.constant dense<0.000000e+00> : vector<2xf32>
    %12 = vector.multi_reduction <add>, %11, %cst_8 [1] : vector<2x256xf32> to vector<2xf32>
    %13 = vector.shape_cast %12 : vector<2xf32> to vector<2x1xf32>
    %c0_9 = arith.constant 0 : index
    %c0_10 = arith.constant 0 : index
    %14 = memref.load %arg5[%c0_9, %c0_10] : memref<1x1xf32, #tpu.memory_space<smem>>
    %15 = vector.broadcast %14 : f32 to vector<2x1xf32>
    %16 = arith.addf %13, %15 : vector<2x1xf32>
    %17 = arith.negf %16 : vector<2x1xf32>
    %18 = math.exp %17 : vector<2x1xf32>
    %cst_11 = arith.constant 1.000000e+00 : f32
    %19 = vector.broadcast %cst_11 : f32 to vector<2x1xf32>
    %20 = arith.addf %19, %18 : vector<2x1xf32>
    %21 = arith.divf %19, %20 : vector<2x1xf32>
    %c0_12 = arith.constant 0 : index
    %c0_13 = arith.constant 0 : index
    %22 = vector.load %arg6[%c0_12, %c0_13] : memref<2x1xf32, #tpu.memory_space<vmem>>, vector<2x1xf32>
    tpu.vector_store %arg6[%c0_12, %c0_13], %21 {strides = array<i32>} : memref<2x1xf32, #tpu.memory_space<vmem>>, vector<2x1xf32>,
    return
  }
  func.func @transform_0(%arg0: i32) -> (i32, i32) {
    %c0_i32 = arith.constant 0 : i32
    %c0_i32_0 = arith.constant 0 : i32
    return %arg0, %c0_i32 : i32, i32
  }
  func.func @transform_1(%arg0: i32) -> (i32, i32) {
    %c0_i32 = arith.constant 0 : i32
    %c0_i32_0 = arith.constant 0 : i32
    %c0_i32_1 = arith.constant 0 : i32
    return %c0_i32, %c0_i32_0 : i32, i32
  }
  func.func @transform_2(%arg0: i32) -> (i32, i32) {
    %c0_i32 = arith.constant 0 : i32
    %c0_i32_0 = arith.constant 0 : i32
    %c0_i32_1 = arith.constant 0 : i32
    return %c0_i32, %c0_i32_0 : i32, i32
  }
  func.func @transform_3(%arg0: i32) -> (i32, i32) {
    %c0_i32 = arith.constant 0 : i32
    %c0_i32_0 = arith.constant 0 : i32
    %c0_i32_1 = arith.constant 0 : i32
    return %c0_i32, %c0_i32_0 : i32, i32
  }
  func.func @transform_4(%arg0: i32) -> (i32, i32) {
    %c0_i32 = arith.constant 0 : i32
    %c0_i32_0 = arith.constant 0 : i32
    %c0_i32_1 = arith.constant 0 : i32
    return %c0_i32, %c0_i32_0 : i32, i32
  }
  func.func @transform_5(%arg0: i32) -> (i32, i32) {
    %c0_i32 = arith.constant 0 : i32
    %c0_i32_0 = arith.constant 0 : i32
    return %arg0, %c0_i32 : i32, i32
  }
}

</mosaic_0001>

<bundles_post_ra>
// kernel: discriminator_z.1
= control target key start
LH: loop header
LB: loop body
LE: loop exit
PB: predicated region body
PF: predicated region fallthrough
CT: control target
= control target key end

     0   :  { %v257_v1 = vmov 0   ;;  %v41_v18 = vlaneseq  ;;  %vm190_vm0 = vcmask 1041408   ;;  %vm205_vm1 = vcmask 1024   ;;  %s351_s1 = inlined_call_operand.vmem [shape: bf16[128,256], index: 1, kind: input, shape index: {}]   ;;  %s352_s0 = inlined_call_operand.vmem [shape: bf16[2,128], index: 0, kind: input, shape index: {}]   ;;  %s353_s2 = inlined_call_operand.vmem [shape: f32[1,256], index: 2, kind: input, shape index: {}]   ;;  %s354_s3 = inlined_call_operand.vmem [shape: f32[1,256], index: 3, kind: input, shape index: {}]   ;;  %s355_s4 = inlined_call_operand.<no memory space> [shape: f32[1,1], index: 4, kind: input, shape index: {}]   ;;  %s356_s5 = inlined_call_operand.vmem [shape: f32[2,1], index: 5, kind: output, shape index: {}]  }
   0x1   :  { %v229_v0 = vld [vmem:[%s351_s1 + $0x4] ss:$8 sps:$4 sm:$0xff]   ;;  %163 = vmatprep.mubr.bf16.mxu0 %v257_v1  ;;  %v231_v2 = vld [vmem:[%s351_s1] ss:$8 sps:$4 sm:$0xff]   ;;  %v232_v3 = vld [vmem:[%s351_s1 + $0x14] ss:$8 sps:$4 sm:$0xff]   ;;  %v197_v43 = vstv %s355_s4 }
   0x2   :  { %131 = vmatprep.subr.bf16.mxu0 %v229_v0  ;;  %v234_v4 = vld [vmem:[%s351_s1 + $0x10] ss:$8 sps:$4 sm:$0xff]   ;;  %v235_v5 = vld [vmem:[%s351_s1 + $0x24] ss:$8 sps:$4 sm:$0xff]   ;;  %v237_v6 = vld [vmem:[%s351_s1 + $0x20] ss:$8 sps:$4 sm:$0xff]  }
   0x3   :  { %132 = vmatpush1.bf16.msra.mxu0 %v231_v2  ;;  %v238_v7 = vld [vmem:[%s351_s1 + $0x34] ss:$8 sps:$4 sm:$0xff]   ;;  %v240_v8 = vld [vmem:[%s351_s1 + $0x30] ss:$8 sps:$4 sm:$0xff]   ;;  %v241_v9 = vld [vmem:[%s351_s1 + $0x44] ss:$8 sps:$4 sm:$0xff]  }
   0x4   :  { %133 = vmatprep.subr.bf16.mxu0 %v232_v3  ;;  %v243_v10 = vld [vmem:[%s351_s1 + $0x40] ss:$8 sps:$4 sm:$0xff]   ;;  %v244_v11 = vld [vmem:[%s351_s1 + $0x54] ss:$8 sps:$4 sm:$0xff]   ;;  %v246_v12 = vld [vmem:[%s351_s1 + $0x50] ss:$8 sps:$4 sm:$0xff]  }
   0x5   :  { %v247_v13 = vld [vmem:[%s351_s1 + $0x64] ss:$8 sps:$4 sm:$0xff]   ;;  %v249_v14 = vld [vmem:[%s351_s1 + $0x60] ss:$8 sps:$4 sm:$0xff]   ;;  %v250_v15 = vld [vmem:[%s351_s1 + $0x74] ss:$8 sps:$4 sm:$0xff]  }
   0x6   :  { %v252_v16 = vld [vmem:[%s351_s1 + $0x70] ss:$8 sps:$4 sm:$0xff]   ;;  %v22_v17 = vld [vmem:[%s352_s0] sm:$0x1]  ;;  %v42_v19 = vshrl.u32 %v41_v18, 7 }
   0x7   :  { %134 = vmatpush1.bf16.msra.mxu0 %v234_v4  ;;  %v39_v21 = vld [vmem:[%s353_s2] sm:$0x3] }
   0x8   :  { %135 = vmatprep.subr.bf16.mxu0 %v235_v5  ;;  %v43_v20 = vsub.s32 0, %v42_v19  ;;  %v47_v22 = vsub.s32 1, %v42_v19  ;;  %v176_v26 = vld [vmem:[%s354_s3] sm:$0x3] }
   0xa   :  { %v44_v23 = vrot.slane %v39_v21, %v43_v20  ;;  %v48_v24 = vrot.slane %v39_v21, %v47_v22  ;;  %v181_v33 = vrot.slane %v176_v26, %v43_v20  ;;  %v185_v35 = vrot.slane %v176_v26, %v47_v22 }
   0xb   :  { %136 = vmatpush1.bf16.msra.mxu0 %v237_v6 }
   0xc   :  { %137 = vmatprep.subr.bf16.mxu0 %v238_v7 }
   0xf   :  { %138 = vmatpush1.bf16.msra.mxu0 %v240_v8 }
  0x10   :  { %139 = vmatprep.subr.bf16.mxu0 %v241_v9 }
  0x13   :  { %140 = vmatpush1.bf16.msra.mxu0 %v243_v10 }
  0x14   :  { %141 = vmatprep.subr.bf16.mxu0 %v244_v11 }
  0x17   :  { %142 = vmatpush1.bf16.msra.mxu0 %v246_v12 }
  0x18   :  { %143 = vmatprep.subr.bf16.mxu0 %v247_v13 }
  0x1b   :  { %144 = vmatpush1.bf16.msra.mxu0 %v249_v14 }
  0x1c   :  { %145 = vmatprep.subr.bf16.mxu0 %v250_v15 }
  0x1f   :  { %146 = vmatpush1.bf16.msra.mxu0 %v252_v16 }
  0x22   :  { %164 = vmatmul.mubr.bf16.vlgmr.msra.gmra.mrb[0].mxu0 %v22_v17 }
  0xf5   :  { %v165_v25 = vpop.f32.mrb[0].mxu0 }
  0xf6   :  { %v166_v27 = vadd.f32 %v165_v25, %v44_v23  ;;  %v167_v28 = vpop.f32.mrb[1].mxu0 }
  0xf7   :  { %v168_v29 = vadd.f32 %v167_v28, %v48_v24  ;;  %v169_v30 = vpop.f32.mrb[2].mxu0 }
  0xf8   :  { %v172_v31 = vmul.f32 0.2, %v166_v27  ;;  %v170_v32 = vpop.f32.mrb[3].mxu0 }
  0xf9   :  { %v173_v34 = vmul.f32 0.2, %v168_v29 }
  0xfa   :  { %v174_v36 = vmax.f32 %v166_v27, %v172_v31 }
  0xfb   :  { %v175_v37 = vmax.f32 %v168_v29, %v173_v34 }
  0xfc   :  { %v188_v38 = vmul.f32 %v181_v33, %v174_v36 }
  0xfd   :  { %v189_v39 = vmul.f32 %v185_v35, %v175_v37 }
  0xfe   :  { %v191_v40 = vsel %vm190_vm0, %v188_v38, 0.0 }
  0xff   :  { %v192_v41 = vsel %vm190_vm0, %v189_v39, 0.0 }
 0x100   :  { %v193_v42 = vadd.f32 %v192_v41, %v191_v40 }
 0x102   :  { %194 = vadd.xlane.f32.xlu0 %v193_v42 }
 0x18f   :  { %v195_v44 = vpop.xlane.xlu0 %194 }
 0x190   :  { %v198_v45 = vadd.f32 %v197_v43, %v195_v44 }
 0x192   :  { %v227_v46 = vmul.f32 -1.442695, %v198_v45 }
 0x194   :  { %253 = vpow2.f32 %v227_v46 }
 0x19e   :  { %v254_v47 = vpop.eup %253 }
 0x19f   :  { %v202_v48 = vadd.f32 1.0, %v254_v47 }
 0x1a1   :  { %255 = vrcp.f32 %v202_v48 }
 0x1ab   :  { %v256_v49 = vpop.eup %255 }
 0x1ac   :  { %206 = vst.msk [vmem:[%s356_s5] sm:$0x3] %vm205_vm1, %v256_v49 }

</bundles_post_ra>
